<compile_context>
chip_gen: v6e
topology: v6e:2x2x1
jax: 0.10.0
libtpu: 0.0.40
codegen_flags: <defaults>
</compile_context>

<pallas_src>
import jax
import jax.numpy as jnp
from jax.experimental import pallas as pl
from jax.experimental.pallas import tpu as pltpu


def _round_up(x, m):
    return ((x + m - 1) // m) * m


def _bernoulli_logits_kernel(x_ref, wt_ref, b_ref, logits_ref):
    # x_ref:      (block_b, num_inputs)   VMEM
    # wt_ref:     (num_inputs, N_pad)     VMEM  (pre-transposed weight, grid-invariant)
    # b_ref:      (1, N_pad)              VMEM  (grid-invariant)
    # logits_ref: (block_b, N_pad)        VMEM  (lane-dense: N_pad % 128 == 0)
    logits_ref[...] = (
        jnp.dot(
            x_ref[...],
            wt_ref[...],
            preferred_element_type=jnp.float32,
            precision=jax.lax.Precision.HIGHEST,
        )
        + b_ref[...]
    )


def bernoulli_forward(x, weight_t_padded, bias_padded, num_outputs):
    """Computes the Bernoulli distribution parameters (logits, probs).

    Args:
      x:                (B, num_inputs) float32 activations.
      weight_t_padded:  (num_inputs, N_pad) float32, W^T zero-padded along
                        the output dim to a multiple of 128.
      bias_padded:      (1, N_pad) float32, zero-padded bias.
      num_outputs:      number of valid output columns.

    Returns:
      (logits, probs), each (B, num_outputs) float32.
    """
    B, num_inputs = x.shape
    n_pad = weight_t_padded.shape[1]

    # Batch tiling:
    #  * small B       -> single full-batch tile (launch overhead dominates anyway)
    #  * large B       -> >= 2 grid steps so the "parallel" axis can shard
    #                     across v7x's two TensorCores, capped at 2048 rows
    #                     per step (~1 MiB output tile at n_pad = 128).
    b_rows = _round_up(B, 8)
    if b_rows <= 1024:
        block_b = b_rows
    else:
        block_b = min(2048, _round_up(pl.cdiv(B, 2), 8))
    grid = (pl.cdiv(B, block_b),)

    # Explicit VMEM budget from the actual (double-buffered) tile sizes, with
    # slack; floored at the smallest default scoped limit (v5e: 16 MiB) and
    # capped below v7x's 64 MiB physical VMEM.
    tile_bytes = 4 * (block_b * num_inputs      # x tile
                      + num_inputs * n_pad      # weight_t
                      + n_pad                   # bias
                      + block_b * n_pad)        # logits tile
    vmem_limit = int(min(64 * 1024 * 1024,
                         max(16 * 1024 * 1024, 4 * tile_bytes)))

    logits_padded = pl.pallas_call(
        _bernoulli_logits_kernel,
        out_shape=jax.ShapeDtypeStruct((B, n_pad), jnp.float32),
        grid=grid,
        in_specs=[
            pl.BlockSpec((block_b, num_inputs), lambda i: (i, 0)),
            pl.BlockSpec((num_inputs, n_pad), lambda i: (0, 0)),
            pl.BlockSpec((1, n_pad), lambda i: (0, 0)),
        ],
        out_specs=pl.BlockSpec((block_b, n_pad), lambda i: (i, 0)),
        compiler_params=pltpu.CompilerParams(
            dimension_semantics=("parallel",),
            vmem_limit_bytes=vmem_limit,
        ),
    )(x, weight_t_padded, bias_padded)

    # Single narrow column slice; sigmoid on the small valid region only
    # (the padded probs output and the row slice from the previous version
    # are gone — this is where half the HBM traffic was saved).
    logits = logits_padded[:, :num_outputs]
    probs = jax.nn.sigmoid(logits)
    return logits, probs


def orthogonal_init(key, rows, cols, gain=1.0, dtype=jnp.float32):
    """Deterministic orthogonal init matching nn.init.orthogonal_ semantics
    (rows of W orthonormal when rows <= cols)."""
    n, m = (rows, cols) if rows >= cols else (cols, rows)
    a = jax.random.normal(key, (n, m), dtype=jnp.float32)
    q, r = jnp.linalg.qr(a)
    # Sign correction for a unique decomposition; avoid jnp.sign so a zero
    # diagonal element cannot zero an entire column.
    d = jnp.diagonal(r)
    q = q * jnp.where(d >= 0, 1.0, -1.0)[None, :]
    if rows < cols:
        q = q.T
    return (gain * q[:rows, :cols]).astype(dtype)


def make_bernoulli_params(key, num_inputs, num_outputs):
    """Builds the (pre-transposed, lane-padded) parameters once at init time.

    Returns (weight, weight_t_padded, bias_padded):
      weight:           (num_outputs, num_inputs) — original nn.Linear layout
                        (kept only for reference checking).
      weight_t_padded:  (num_inputs, N_pad) with N_pad = round_up(num_outputs, 128).
      bias_padded:      (1, N_pad), zeros (matches constant_(b, 0) init).
    """
    weight = orthogonal_init(key, num_outputs, num_inputs)   # nn.Linear layout
    n_pad = _round_up(num_outputs, 128)
    weight_t_padded = jnp.zeros((num_inputs, n_pad), jnp.float32)
    weight_t_padded = weight_t_padded.at[:, :num_outputs].set(weight.T)
    bias_padded = jnp.zeros((1, n_pad), jnp.float32)          # bias init is 0
    return weight, weight_t_padded, bias_padded


if __name__ == "__main__":
    key = jax.random.PRNGKey(0)
    k_w, k_x = jax.random.split(key)

    batch = 8
    num_inputs = 32
    num_outputs = 6

    weight, weight_t_padded, bias_padded = make_bernoulli_params(
        k_w, num_inputs, num_outputs)
    bias = jnp.zeros((num_outputs,), dtype=jnp.float32)

    x = jax.random.normal(k_x, (batch, num_inputs), dtype=jnp.float32)

    logits, probs = bernoulli_forward(x, weight_t_padded, bias_padded,
                                      num_outputs)
    jax.block_until_ready((logits, probs))

    # Reference check in plain JAX.
    ref_logits = x @ weight.T + bias
    ref_probs = jax.nn.sigmoid(ref_logits)
    assert logits.shape == (batch, num_outputs)
    assert probs.shape == (batch, num_outputs)
    assert jnp.allclose(logits, ref_logits, atol=1e-5, rtol=1e-5)
    assert jnp.allclose(probs, ref_probs, atol=1e-5, rtol=1e-5)

    print("KERNEL_OK")
</pallas_src>

<mosaic_0001>
module attributes {stable_mosaic.version = 11 : i64} {
  func.func @_bernoulli_logits_kernel(%arg0: i32, %arg1: memref<8x32xf32, #tpu.memory_space<vmem>>, %arg2: memref<32x128xf32, #tpu.memory_space<vmem>>, %arg3: memref<1x128xf32, #tpu.memory_space<vmem>>, %arg4: memref<8x128xf32, #tpu.memory_space<vmem>>) attributes {dimension_semantics = [#tpu.dimension_semantics<parallel>], iteration_bounds = array<i64: 1>, scalar_prefetch = 0 : i64, scratch_operands = 0 : i64, tpu.core_type = #tpu.core_type<tc>, window_params = [{transform_indices = @transform_0, window_bounds = array<i64: 8, 32>}, {pipeline_mode = #tpu.pipeline_mode<synchronous>, transform_indices = @transform_1, window_bounds = array<i64: 32, 128>}, {pipeline_mode = #tpu.pipeline_mode<synchronous>, transform_indices = @transform_2, window_bounds = array<i64: 1, 128>}, {transform_indices = @transform_3, window_bounds = array<i64: 8, 128>}]} {
    %c0 = arith.constant 0 : index
    %c0_0 = arith.constant 0 : index
    %0 = vector.load %arg1[%c0, %c0_0] : memref<8x32xf32, #tpu.memory_space<vmem>>, vector<8x32xf32>
    %c0_1 = arith.constant 0 : index
    %c0_2 = arith.constant 0 : index
    %1 = vector.load %arg2[%c0_1, %c0_2] : memref<32x128xf32, #tpu.memory_space<vmem>>, vector<32x128xf32>
    %cst = arith.constant dense<0.000000e+00> : vector<8x128xf32>
    %2 = tpu.matmul %0, %1, %cst {dimension_numbers = #tpu.dot_dimension_numbers<[1], [0], [0], [1], [0, 0, 1, 1], [], []>, precision = #tpu.contract_precision<fp32>} : vector<8x32xf32>, vector<32x128xf32>, vector<8x128xf32> -> vector<8x128xf32>
    %c0_3 = arith.constant 0 : index
    %c0_4 = arith.constant 0 : index
    %3 = vector.load %arg3[%c0_3, %c0_4] : memref<1x128xf32, #tpu.memory_space<vmem>>, vector<1x128xf32>
    %4 = vector.broadcast %3 : vector<1x128xf32> to vector<8x128xf32>
    %5 = arith.addf %2, %4 : vector<8x128xf32>
    %c0_5 = arith.constant 0 : index
    %c0_6 = arith.constant 0 : index
    %6 = vector.load %arg4[%c0_5, %c0_6] : memref<8x128xf32, #tpu.memory_space<vmem>>, vector<8x128xf32>
    tpu.vector_store %arg4[%c0_5, %c0_6], %5 {strides = array<i32>} : memref<8x128xf32, #tpu.memory_space<vmem>>, vector<8x128xf32>,
    return
  }
  func.func @transform_0(%arg0: i32) -> (i32, i32) {
    %c0_i32 = arith.constant 0 : i32
    %c0_i32_0 = arith.constant 0 : i32
    return %arg0, %c0_i32 : i32, i32
  }
  func.func @transform_1(%arg0: i32) -> (i32, i32) {
    %c0_i32 = arith.constant 0 : i32
    %c0_i32_0 = arith.constant 0 : i32
    %c0_i32_1 = arith.constant 0 : i32
    return %c0_i32, %c0_i32_0 : i32, i32
  }
  func.func @transform_2(%arg0: i32) -> (i32, i32) {
    %c0_i32 = arith.constant 0 : i32
    %c0_i32_0 = arith.constant 0 : i32
    %c0_i32_1 = arith.constant 0 : i32
    return %c0_i32, %c0_i32_0 : i32, i32
  }
  func.func @transform_3(%arg0: i32) -> (i32, i32) {
    %c0_i32 = arith.constant 0 : i32
    %c0_i32_0 = arith.constant 0 : i32
    return %arg0, %c0_i32 : i32, i32
  }
}

</mosaic_0001>

<bundles_post_ra>
// kernel: tpu_custom_call.1
= control target key start
LH: loop header
LB: loop body
LE: loop exit
PB: predicated region body
PF: predicated region fallthrough
CT: control target
= control target key end

     0   :  { %8 = vsyncpa [#allocation3], 0  ;;  %s834_s0 = inlined_call_operand.hbm [shape: f32[8,32], index: 0, kind: input, shape index: {}]   ;;  %s835_s1 = inlined_call_operand.hbm [shape: f32[32,128], index: 1, kind: input, shape index: {}]   ;;  %s836_s2 = inlined_call_operand.vmem [shape: f32[1,128], index: 2, kind: input, shape index: {}]   ;;  %s837_s3 = inlined_call_operand.hbm [shape: f32[8,128], index: 3, kind: output, shape index: {}]  }
   0x1   :  { %9 = vsyncpa [#allocation6], 0 }
   0x2   :  { %10 = vsyncpa [#allocation4], 0  ;;  %s729_s12 = smov [#allocation2]   ;;  %s730_s14 = smov [#allocation5]  }
   0x3   :  { %s17_s13 = sshll.u32 %s729_s12, 4  ;;  %s26_s15 = sshll.u32 %s730_s14, 4  ;;  %s18_s13 = int_to_ptr.vmem [resolvable:$true] %s17_s13  ;;  %s27_s15 = int_to_ptr.vmem [resolvable:$true] %s26_s15 }
   0x4   :  { %s671_s16 = scalar_lea.vmem %s18_s13, 128  ;;  %p676_p1 = scmp.lt.s32.totalorder %s18_s13, %s18_s13 }
   0x5   :  { %p672_p0 = scmp.ne.s32.totalorder %s18_s13, %s671_s16  ;;  %p677_p2 = scmp.lt.s32.totalorder %s671_s16, %s671_s16 }
   0x7   :  { %p678_p3 = por %p677_p2, %p676_p1 }
   0x9   :  { %p679_p4 = pnand %p678_p3, %p672_p0 }
   0xb   :  { %682 = shalt.err (!%p679_p4)
}
   0xc   :  { %20 = dma.hbm_to_vmem [thread:$0]  %s834_s0, 128, %s18_s13, [#allocation3]  }
   0xd   :  { %s691_s19 = scalar_lea.vmem %s27_s15, 512  ;;  %p696_p6 = scmp.lt.s32.totalorder %s27_s15, %s27_s15 }
   0xe   :  { %p692_p5 = scmp.ne.s32.totalorder %s27_s15, %s691_s19  ;;  %p697_p7 = scmp.lt.s32.totalorder %s691_s19, %s691_s19 }
  0x10   :  { %p698_p8 = por %p697_p7, %p696_p6 }
  0x12   :  { %p699_p9 = pnand %p698_p8, %p692_p5 }
  0x14   :  { %702 = shalt.err (!%p699_p9)
}
  0x15   :  { %s731_s20 = smov 128   ;;  %s732_s21 = smov 8  }
  0x16   :  { %32 = dma.hbm_to_vmem [thread:$0]  %s835_s1, 512, %s27_s15, [#allocation6], %s731_s20, %s731_s20, %s732_s21  }
  0x17   :  { %723 = dma.done.wait [#allocation3], 128  }
  0x18   :  { %724 = vsyncadd [#allocation3], 4294967168 }
  0x19   :  { %725 = dma.done.wait [#allocation6], 512  }
  0x1a   :  { %726 = vsyncadd [#allocation6], 4294966784  ;;  %v733_v0 = vmov 0.0   ;;  %vm734_vm0 = vmmov 0   ;;  %vm53_vm1 = vcmask 261120   ;;  %v45_v1 = vld [vmem:[#allocation5 + $0x18] sm:$0xff] }
  0x1b   :  { %590 = vmatprep.subr.mxu0 %v733_v0  ;;  %601 = vmatprep.subr.mxu1 %v733_v0  ;;  %v44_v2 = vld [vmem:[#allocation5 + $0x10] sm:$0xff]  ;;  %v43_v3 = vld [vmem:[#allocation5 + $0x8] sm:$0xff]  ;;  %v768_v4 = vand.u32 4294901760, %v45_v1  ;;  %v42_v7 = vld [vmem:[#allocation5] sm:$0xff]  ;;  %s735_s24 = smov [#allocation7]  }
  0x1c   :  { %598 = vmatprep.mubr.msk.f32.mxu0 %vm734_vm0, %v733_v0  ;;  %609 = vmatprep.mubr.msk.f32.mxu1 %vm734_vm0, %v733_v0  ;;  %v770_v5 = vand.u32 4294901760, %v44_v2  ;;  %v772_v6 = vand.u32 4294901760, %v43_v3  ;;  %v41_v8 = vld [vmem:[#allocation2] sm:$0xff]  ;;  %v774_v9 = vand.u32 4294901760, %v42_v7  ;;  %s549_s25 = sshll.u32 %s735_s24, 4  ;;  %s550_s25 = int_to_ptr.vmem [resolvable:$true] %s549_s25 }
  0x1d   :  { %v55_v10 = vsel %vm53_vm1, %v41_v8, 0  ;;  %591 = vmatpush3.msra.mxu0 %v768_v4  ;;  %v162_v11 = vsub.f32 %v45_v1, %v768_v4  ;;  %v559_v35 = vld [vmem:[%s836_s2] ss:$0 sm:$0xff]  ;;  %s703_s2 = scalar_lea.vmem %s550_s25, 128  ;;  %p708_p11 = scmp.lt.s32.totalorder %s550_s25, %s550_s25 }
  0x1e   :  { %v778_v12 = vand.u32 4294901760, %v55_v10  ;;  %v169_v13 = vsub.f32 %v44_v2, %v770_v5  ;;  %v176_v14 = vsub.f32 %v43_v3, %v772_v6  ;;  %592 = vmatprep.subr.mxu0 %v733_v0  ;;  %v183_v15 = vsub.f32 %v42_v7, %v774_v9  ;;  %p704_p10 = scmp.ne.s32.totalorder %s550_s25, %s703_s2  ;;  %p709_p12 = scmp.lt.s32.totalorder %s703_s2, %s703_s2 }
  0x1f   :  { %593 = vmatpush3.msra.mxu0 %v770_v5  ;;  %v163_v16 = vand.u32 4294901760, %v162_v11 }
  0x20   :  { %v127_v17 = vsub.f32 %v55_v10, %v778_v12  ;;  %v170_v18 = vand.u32 4294901760, %v169_v13  ;;  %v177_v19 = vand.u32 4294901760, %v176_v14  ;;  %594 = vmatprep.subr.mxu0 %v733_v0  ;;  %v184_v20 = vand.u32 4294901760, %v183_v15  ;;  %p710_p13 = por %p709_p12, %p708_p11 }
  0x21   :  { %595 = vmatpush3.msra.mxu0 %v772_v6  ;;  %v164_v21 = vsub.f32 %v162_v11, %v163_v16 }
  0x22   :  { %v128_v22 = vand.u32 4294901760, %v127_v17  ;;  %v171_v23 = vsub.f32 %v169_v13, %v170_v18  ;;  %v178_v24 = vsub.f32 %v176_v14, %v177_v19  ;;  %596 = vmatprep.subr.mxu0 %v733_v0  ;;  %v185_v28 = vsub.f32 %v183_v15, %v184_v20  ;;  %p711_p0 = pnand %p710_p13, %p704_p10 }
  0x23   :  { %597 = vmatpush3.msra.mxu0 %v774_v9  ;;  %v165_v25 = vand.u32 4294901760, %v164_v21 }
  0x24   :  { %v129_v26 = vsub.f32 %v127_v17, %v128_v22  ;;  %v172_v27 = vand.u32 4294901760, %v171_v23  ;;  %612 = vmatprep.subr.mxu0 %v733_v0  ;;  %v179_v30 = vand.u32 4294901760, %v178_v24  ;;  %v186_v31 = vand.u32 4294901760, %v185_v28 }
  0x25   :  { %602 = vmatpush3.msra.mxu1 %v165_v25 }
  0x26   :  { %v130_v29 = vand.u32 4294901760, %v129_v26  ;;  %603 = vmatprep.subr.mxu1 %v733_v0 }
  0x27   :  { %604 = vmatpush3.msra.mxu1 %v172_v27 }
  0x28   :  { %599 = vmatmul.mubr.f32.vlgmr.msra.gmra.mxu0 %v130_v29  ;;  %605 = vmatprep.subr.mxu1 %v733_v0 }
  0x29   :  { %613 = vmatpush3.msra.mxu0 %v162_v11  ;;  %606 = vmatpush3.msra.mxu1 %v179_v30 }
  0x2a   :  { %614 = vmatprep.subr.mxu0 %v733_v0  ;;  %607 = vmatprep.subr.mxu1 %v733_v0 }
  0x2b   :  { %615 = vmatpush3.msra.mxu0 %v169_v13  ;;  %608 = vmatpush3.msra.mxu1 %v186_v31 }
  0x2c   :  { %616 = vmatprep.subr.mxu0 %v733_v0  ;;  %610 = vmatmul.mubr.f32.vlgmr.msra.gmra.mxu1 %v778_v12 }
  0x2d   :  { %617 = vmatpush3.msra.mxu0 %v176_v14  ;;  %623 = vmatprep.subr.mxu1 %v733_v0 }
  0x2e   :  { %618 = vmatprep.subr.mxu0 %v733_v0  ;;  %624 = vmatpush3.msra.mxu1 %v768_v4 }
  0x2f   :  { %619 = vmatpush3.msra.mxu0 %v183_v15  ;;  %620 = vmatprep.mubr.msk.f32.mxu0 %vm734_vm0, %v733_v0 }
  0x30   :  { %625 = vmatprep.subr.mxu1 %v733_v0  ;;  %634 = vmatprep.subr.mxu0 %v733_v0 }
  0x31   :  { %621 = vmatmul.mubr.f32.vlgmr.msra.gmra.mxu0 %v127_v17  ;;  %626 = vmatpush3.msra.mxu1 %v770_v5 }
  0x32   :  { %635 = vmatpush3.msra.mxu0 %v163_v16  ;;  %627 = vmatprep.subr.mxu1 %v733_v0 }
  0x33   :  { %636 = vmatprep.subr.mxu0 %v733_v0  ;;  %628 = vmatpush3.msra.mxu1 %v772_v6 }
  0x34   :  { %637 = vmatpush3.msra.mxu0 %v170_v18  ;;  %629 = vmatprep.subr.mxu1 %v733_v0 }
  0x35   :  { %638 = vmatprep.subr.mxu0 %v733_v0  ;;  %630 = vmatpush3.msra.mxu1 %v774_v9 }
  0x36   :  { %631 = vmatprep.mubr.msk.f32.mxu1 %vm734_vm0, %v733_v0  ;;  %639 = vmatpush3.msra.mxu0 %v177_v19 }
  0x37   :  { %632 = vmatmul.mubr.f32.vlgmr.msra.gmra.mxu1 %v128_v22  ;;  %640 = vmatprep.subr.mxu0 %v733_v0 }
  0x38   :  { %645 = vmatprep.subr.mxu1 %v733_v0  ;;  %641 = vmatpush3.msra.mxu0 %v184_v20 }
  0x39   :  { %642 = vmatprep.mubr.msk.f32.mxu0 %vm734_vm0, %v733_v0  ;;  %646 = vmatpush3.msra.mxu1 %v768_v4 }
  0x3a   :  { %643 = vmatmul.mubr.f32.vlgmr.msra.gmra.mxu0 %v778_v12  ;;  %647 = vmatprep.subr.mxu1 %v733_v0 }
  0x3b   :  { %653 = vmatprep.mubr.msk.f32.mxu1 %vm734_vm0, %v733_v0  ;;  %648 = vmatpush3.msra.mxu1 %v770_v5 }
  0x3c   :  { %649 = vmatprep.subr.mxu1 %v733_v0 }
  0x3d   :  { %650 = vmatpush3.msra.mxu1 %v772_v6 }
  0x3e   :  { %651 = vmatprep.subr.mxu1 %v733_v0 }
  0x3f   :  { %652 = vmatpush3.msra.mxu1 %v774_v9 }
  0x40   :  { %654 = vmatmul.mubr.f32.vlgmr.msra.gmra.mxu1 %v778_v12 }
  0xe8   :  { %v132_v32 = vpop.f32.mrf.mxu0 }
  0xe9   :  { %v133_v38 = vadd.f32 %v559_v35, %v132_v32 }
  0xea   :  { %v600_v33 = vpop.f32.mrf.mxu0 }
  0xec   :  { %v223_v34 = vpop.f32.mrf.mxu1 }
  0xed   :  { %v224_v40 = vadd.f32 %v223_v34, %v133_v38 }
  0xee   :  { %v611_v36 = vpop.f32.mrf.mxu1 }
  0xf1   :  { %v303_v37 = vpop.f32.mrf.mxu0 }
  0xf2   :  { %v304_v43 = vadd.f32 %v303_v37, %v224_v40 }
  0xf3   :  { %v622_v39 = vpop.f32.mrf.mxu0 }
  0xf7   :  { %v380_v41 = vpop.f32.mrf.mxu1 }
  0xf8   :  { %v381_v45 = vadd.f32 %v380_v41, %v304_v43 }
  0xf9   :  { %v633_v42 = vpop.f32.mrf.mxu1 }
  0xfa   :  { %v463_v44 = vpop.f32.mrf.mxu0 }
  0xfb   :  { %v464_v47 = vadd.f32 %v463_v44, %v381_v45 }
  0xfc   :  { %v644_v46 = vpop.f32.mrf.mxu0 }
 0x100   :  { %v538_v48 = vpop.f32.mrf.mxu1 }
 0x101   :  { %v539_v49 = vadd.f32 %v538_v48, %v464_v47 }
 0x102   :  { %v655_v50 = vpop.f32.mrf.mxu1 }
 0x103   :  { %542 = vst [vmem:[#allocation7] sm:$0xff] %v539_v49 }
 0x104   :  { %714 = shalt.err (!%p711_p0)
}
 0x105   :  { %552 = dma.vmem_to_hbm [thread:$0]  %s550_s25, 128, %s837_s3, [#allocation4]  }
 0x106   :  { %727 = dma.done.wait [#allocation4], 128  }
 0x107   :  { %728 = vsyncadd [#allocation4], 4294967168 }
 0x108   :  { %556 = vsyncpa [#allocation3], 1 }
 0x109   :  { %557 = vsyncpa [#allocation6], 1 }
 0x10a   :  { %558 = vsyncpa [#allocation4], 1 }

</bundles_post_ra>
